<compile_context>
chip_gen: v7x
topology: tpu7x:2x2x1
jax: 0.10.0
libtpu: 0.0.40
codegen_flags: <defaults>
</compile_context>

<pallas_src>
import jax
import jax.numpy as jnp
from jax.experimental import pallas as pl
from jax.experimental.pallas import tpu as pltpu


def _round_up(x, m):
    return ((x + m - 1) // m) * m


# ----------------------------- fused streaming forward kernel -----------------------------
def fused_gru_siamese_kernel(tok_ref, proj_ref, w_hh_ref, b_hn_ref, lens_ref,
                             w1_ref, b1_ref, w2_ref, b2_ref, out_ref, h_ref):
    """tok_ref: (T, 2B) int32 token ids in SMEM (scalar prefetch);
    proj_ref: (V, 3Hp) = emb @ W_ih^T with b_ih (+ b_hh for r/z) folded, gate-padded;
    w_hh_ref: (Hp, 3Hp) gate-padded W_hh^T; b_hn_ref: (B2p, Hp) pre-broadcast n-gate bias;
    lens_ref: (B2p, 1) int32 lengths; w1/b1/w2/b2: padded FC head; h_ref: persistent h."""
    t = pl.program_id(0)
    n_t = pl.num_programs(0)
    B2 = tok_ref.shape[1]
    B2p, Hp = h_ref.shape
    B = out_ref.shape[0]

    @pl.when(t == 0)
    def _init():
        h_ref[...] = jnp.zeros_like(h_ref)

    # Embedding lookup + input projection = row gather from the resident proj table.
    rows = [proj_ref[pl.ds(tok_ref[t, b], 1), :] for b in range(B2)]
    if B2p > B2:
        rows.append(jnp.zeros((B2p - B2, 3 * Hp), jnp.float32))
    gi = jnp.concatenate(rows, axis=0)                               # (B2p, 3Hp), biases folded

    h = h_ref[...]
    gh = jnp.dot(h, w_hh_ref[...], preferred_element_type=jnp.float32)  # (B2p, 3Hp)

    # Gate slabs start at 128-lane boundaries -> free views.
    r = jax.nn.sigmoid(gi[:, 0:Hp] + gh[:, 0:Hp])
    z = jax.nn.sigmoid(gi[:, Hp:2 * Hp] + gh[:, Hp:2 * Hp])
    n = jnp.tanh(gi[:, 2 * Hp:3 * Hp] + r * (gh[:, 2 * Hp:3 * Hp] + b_hn_ref[...]))
    h_new = n + z * (h - n)                                          # == (1-z)*n + z*h
    # pack_padded_sequence final-hidden semantics: stop updating once t >= len[b].
    h = jnp.where(lens_ref[...] > t, h_new, h)
    h_ref[...] = h

    # 'hstates' combine -> fc1 -> ReLU -> fc2, only on the last time step.
    @pl.when(t == n_t - 1)
    def _head():
        h1 = h[0:B, :]
        h2 = h[B:2 * B, :]
        combined = jnp.concatenate([h1, h2, h1 * h2, h1 - h2], axis=1)   # (B, 4Hp)
        y = jnp.dot(combined, w1_ref[...], preferred_element_type=jnp.float32) + b1_ref[...]
        y = jnp.maximum(y, 0.0)                                          # F.relu
        out_ref[...] = jnp.dot(y, w2_ref[...], preferred_element_type=jnp.float32) + b2_ref[...]


# ----------------------------- wrapper: layout prep + pallas_call -----------------------------
def _pad_gate_cols(x, H, Hp):
    """(R, 3H) -> (R, 3Hp): each gate slab zero-padded to a 128-lane boundary."""
    parts = [jnp.pad(x[:, g * H:(g + 1) * H], ((0, 0), (0, Hp - H))) for g in range(3)]
    return jnp.concatenate(parts, axis=1)


def two_parallel_rnns_forward(params, x1_seq, len1, x2_seq, len2):
    T, B = x1_seq.shape
    V, E = params["emb"].shape
    H = params["w_hh_t"].shape[0]
    F1 = params["w1_t"].shape[1]
    OUT = params["w2_t"].shape[1]

    Hp = _round_up(H, 128)
    F1p = _round_up(F1, 128)
    B2 = 2 * B
    B2p = _round_up(max(B2, 8), 8)

    # Tokens for both sequences stacked along batch: rows 0..B-1 = seq1, B..2B-1 = seq2.
    tok = jnp.concatenate([x1_seq, x2_seq], axis=1).astype(jnp.int32)       # (T, 2B)
    tok = jnp.clip(tok, 0, V - 1)        # the in-kernel gather has no bounds check
    lens = jnp.concatenate([len1, len2], axis=0).astype(jnp.int32)          # (2B,)
    lens_pad = jnp.zeros((B2p, 1), jnp.int32).at[:B2, 0].set(lens)

    # Fold biases and hoist the input projection: gi[token] = proj[token] (time-invariant).
    b_ih, b_hh = params["b_ih"], params["b_hh"]
    b_gi = jnp.concatenate([b_ih[:, :2 * H] + b_hh[:, :2 * H], b_ih[:, 2 * H:]], axis=1)
    proj = jnp.dot(params["emb"], params["w_ih_t"]) + b_gi                  # (V, 3H)
    proj_pad = _pad_gate_cols(proj, H, Hp)                                  # (V, 3Hp)

    w_hh_pad = jnp.pad(_pad_gate_cols(params["w_hh_t"], H, Hp), ((0, Hp - H), (0, 0)))
    b_hn_pad = jnp.broadcast_to(jnp.pad(b_hh[:, 2 * H:], ((0, 0), (0, Hp - H))), (B2p, Hp))

    w1 = params["w1_t"]                                                     # (4H, F1)
    w1_pad = jnp.concatenate(
        [jnp.pad(w1[g * H:(g + 1) * H], ((0, Hp - H), (0, F1p - F1))) for g in range(4)],
        axis=0)                                                             # (4Hp, F1p)
    b1_pad = jnp.pad(params["b1"], ((0, 0), (0, F1p - F1)))
    w2_pad = jnp.pad(params["w2_t"], ((0, F1p - F1), (0, 0)))               # (F1p, OUT)
    b2 = params["b2"]

    grid_spec = pltpu.PrefetchScalarGridSpec(
        num_scalar_prefetch=1,                 # tokens -> SMEM
        grid=(T,),
        in_specs=[
            pl.BlockSpec((V, 3 * Hp), lambda t, tok: (0, 0)),     # proj (resident)
            pl.BlockSpec((Hp, 3 * Hp), lambda t, tok: (0, 0)),    # w_hh^T
            pl.BlockSpec((B2p, Hp), lambda t, tok: (0, 0)),       # b_hn pre-broadcast
            pl.BlockSpec((B2p, 1), lambda t, tok: (0, 0)),        # lengths
            pl.BlockSpec((4 * Hp, F1p), lambda t, tok: (0, 0)),   # fc1 weight^T
            pl.BlockSpec((1, F1p), lambda t, tok: (0, 0)),        # fc1 bias
            pl.BlockSpec((F1p, OUT), lambda t, tok: (0, 0)),      # fc2 weight^T
            pl.BlockSpec((1, OUT), lambda t, tok: (0, 0)),        # fc2 bias
        ],
        out_specs=pl.BlockSpec((B, OUT), lambda t, tok: (0, 0)),
        scratch_shapes=[pltpu.VMEM((B2p, Hp), jnp.float32)],      # persistent h
    )

    return pl.pallas_call(
        fused_gru_siamese_kernel,
        out_shape=jax.ShapeDtypeStruct((B, OUT), jnp.float32),
        grid_spec=grid_spec,
        compiler_params=pltpu.CompilerParams(
            dimension_semantics=("arbitrary",),        # serial recurrence over time
            vmem_limit_bytes=32 * 1024 * 1024),        # headroom even on v7x (64 MiB)
    )(tok, proj_pad, w_hh_pad, b_hn_pad, lens_pad, w1_pad, b1_pad, w2_pad, b2)


# ----------------------------- pure-JAX reference for sanity check -----------------------------
def _gru_ref(x_emb, lens, w_ih_t, w_hh_t, b_ih, b_hh):
    T, B, E = x_emb.shape
    H = w_hh_t.shape[0]
    h = jnp.zeros((B, H), jnp.float32)
    for t in range(T):
        gi = x_emb[t] @ w_ih_t + b_ih
        gh = h @ w_hh_t + b_hh
        r = jax.nn.sigmoid(gi[:, :H] + gh[:, :H])
        z = jax.nn.sigmoid(gi[:, H:2 * H] + gh[:, H:2 * H])
        n = jnp.tanh(gi[:, 2 * H:] + r * gh[:, 2 * H:])
        h_new = (1 - z) * n + z * h
        h = jnp.where((lens > t)[:, None], h_new, h)
    return h


def _forward_ref(params, x1_seq, len1, x2_seq, len2):
    x1_emb = jnp.take(params["emb"], x1_seq, axis=0)
    x2_emb = jnp.take(params["emb"], x2_seq, axis=0)
    h1 = _gru_ref(x1_emb, len1, params["w_ih_t"], params["w_hh_t"], params["b_ih"], params["b_hh"])
    h2 = _gru_ref(x2_emb, len2, params["w_ih_t"], params["w_hh_t"], params["b_ih"], params["b_hh"])
    combined = jnp.concatenate([h1, h2, h1 * h2, h1 - h2], axis=1)
    y = jnp.maximum(combined @ params["w1_t"] + params["b1"], 0.0)
    return y @ params["w2_t"] + params["b2"]


# ----------------------------- deterministic parameter init -----------------------------
def init_params(key, vocab_size, E, H, fc1_out, out_dim):
    ks = jax.random.split(key, 9)
    s_gru = 1.0 / jnp.sqrt(H)
    s_fc1 = 1.0 / jnp.sqrt(4.0 * H)
    s_fc2 = 1.0 / jnp.sqrt(1.0 * fc1_out)
    u = lambda k, shape, s: jax.random.uniform(k, shape, jnp.float32, -s, s)
    return {
        "emb": jax.random.normal(ks[0], (vocab_size, E), jnp.float32),
        "w_ih_t": u(ks[1], (E, 3 * H), s_gru),      # (E, 3H), gate order r,z,n
        "w_hh_t": u(ks[2], (H, 3 * H), s_gru),      # (H, 3H)
        "b_ih": u(ks[3], (1, 3 * H), s_gru),
        "b_hh": u(ks[4], (1, 3 * H), s_gru),
        "w1_t": u(ks[5], (4 * H, fc1_out), s_fc1),  # fc1: in = 4*H (hstates, unidir)
        "b1": u(ks[6], (1, fc1_out), s_fc1),
        "w2_t": u(ks[7], (fc1_out, out_dim), s_fc2),
        "b2": u(ks[8], (1, out_dim), s_fc2),
    }


if __name__ == "__main__":
    T, B = 8, 2
    VOCAB, E, H = 32, 16, 32
    FC1_OUT, OUT_DIM = 32, 2

    key = jax.random.PRNGKey(0)
    k_par, k_x1, k_x2 = jax.random.split(key, 3)
    params = init_params(k_par, VOCAB, E, H, FC1_OUT, OUT_DIM)

    x1_seq = jax.random.randint(k_x1, (T, B), 0, VOCAB, dtype=jnp.int32)  # (T, B) seq-first
    x2_seq = jax.random.randint(k_x2, (T, B), 0, VOCAB, dtype=jnp.int32)  # (T, B)
    len1 = jnp.array([8, 5], dtype=jnp.int32)
    len2 = jnp.array([6, 8], dtype=jnp.int32)

    fwd = jax.jit(two_parallel_rnns_forward)
    out = jax.block_until_ready(fwd(params, x1_seq, len1, x2_seq, len2))

    ref = _forward_ref(params, x1_seq, len1, x2_seq, len2)
    assert out.shape == (B, OUT_DIM)
    assert jnp.allclose(out, ref, atol=1e-3, rtol=1e-3), (out, ref)

    print("KERNEL_OK")
</pallas_src>

<mosaic_0001>
module attributes {stable_mosaic.version = 11 : i64} {
  func.func @fused_gru_siamese_kernel(%arg0: i32, %arg1: memref<8x4xi32, #tpu.memory_space<smem>>, %arg2: memref<32x384xf32, #tpu.memory_space<vmem>>, %arg3: memref<128x384xf32, #tpu.memory_space<vmem>>, %arg4: memref<8x128xf32, #tpu.memory_space<vmem>>, %arg5: memref<8x1xi32, #tpu.memory_space<vmem>>, %arg6: memref<512x128xf32, #tpu.memory_space<vmem>>, %arg7: memref<1x128xf32, #tpu.memory_space<vmem>>, %arg8: memref<128x2xf32, #tpu.memory_space<vmem>>, %arg9: memref<1x2xf32, #tpu.memory_space<vmem>>, %arg10: memref<2x2xf32, #tpu.memory_space<vmem>>, %arg11: memref<8x128xf32, #tpu.memory_space<vmem>>) attributes {dimension_semantics = [#tpu.dimension_semantics<arbitrary>], iteration_bounds = array<i64: 8>, scalar_prefetch = 1 : i64, scratch_operands = 1 : i64, tpu.core_type = #tpu.core_type<tc>, window_params = [{pipeline_mode = #tpu.pipeline_mode<synchronous>, transform_indices = @transform_0, window_bounds = array<i64: 32, 384>}, {pipeline_mode = #tpu.pipeline_mode<synchronous>, transform_indices = @transform_1, window_bounds = array<i64: 128, 384>}, {pipeline_mode = #tpu.pipeline_mode<synchronous>, transform_indices = @transform_2, window_bounds = array<i64: 8, 128>}, {pipeline_mode = #tpu.pipeline_mode<synchronous>, transform_indices = @transform_3, window_bounds = array<i64: 8, 1>}, {pipeline_mode = #tpu.pipeline_mode<synchronous>, transform_indices = @transform_4, window_bounds = array<i64: 512, 128>}, {pipeline_mode = #tpu.pipeline_mode<synchronous>, transform_indices = @transform_5, window_bounds = array<i64: 1, 128>}, {pipeline_mode = #tpu.pipeline_mode<synchronous>, transform_indices = @transform_6, window_bounds = array<i64: 128, 2>}, {pipeline_mode = #tpu.pipeline_mode<synchronous>, transform_indices = @transform_7, window_bounds = array<i64: 1, 2>}, {pipeline_mode = #tpu.pipeline_mode<synchronous>, transform_indices = @transform_8, window_bounds = array<i64: 2, 2>}]} {
    %c0_i32 = arith.constant 0 : i32
    %0 = arith.cmpi eq, %arg0, %c0_i32 : i32
    %1 = arith.extui %0 : i1 to i32
    %c0_i32_0 = arith.constant 0 : i32
    %2 = arith.cmpi ne, %1, %c0_i32_0 : i32
    scf.if %2 {
      %cst_19 = arith.constant 0.000000e+00 : f32
      %60 = vector.broadcast %cst_19 : f32 to vector<8x128xf32>
      %c0_20 = arith.constant 0 : index
      %c0_21 = arith.constant 0 : index
      %61 = vector.load %arg11[%c0_20, %c0_21] : memref<8x128xf32, #tpu.memory_space<vmem>>, vector<8x128xf32>
      tpu.vector_store %arg11[%c0_20, %c0_21], %60 {strides = array<i32>} : memref<8x128xf32, #tpu.memory_space<vmem>>, vector<8x128xf32>,
    } else {
    }
    %3 = arith.index_cast %arg0 : i32 to index
    %c0 = arith.constant 0 : index
    %4 = memref.load %arg1[%3, %c0] : memref<8x4xi32, #tpu.memory_space<smem>>
    %5 = arith.index_cast %4 : i32 to index
    %c0_1 = arith.constant 0 : index
    %6 = vector.load %arg2[%5, %c0_1] : memref<32x384xf32, #tpu.memory_space<vmem>>, vector<1x384xf32>
    %7 = arith.index_cast %arg0 : i32 to index
    %c1 = arith.constant 1 : index
    %8 = memref.load %arg1[%7, %c1] : memref<8x4xi32, #tpu.memory_space<smem>>
    %9 = arith.index_cast %8 : i32 to index
    %c0_2 = arith.constant 0 : index
    %10 = vector.load %arg2[%9, %c0_2] : memref<32x384xf32, #tpu.memory_space<vmem>>, vector<1x384xf32>
    %11 = arith.index_cast %arg0 : i32 to index
    %c2 = arith.constant 2 : index
    %12 = memref.load %arg1[%11, %c2] : memref<8x4xi32, #tpu.memory_space<smem>>
    %13 = arith.index_cast %12 : i32 to index
    %c0_3 = arith.constant 0 : index
    %14 = vector.load %arg2[%13, %c0_3] : memref<32x384xf32, #tpu.memory_space<vmem>>, vector<1x384xf32>
    %15 = arith.index_cast %arg0 : i32 to index
    %c3 = arith.constant 3 : index
    %16 = memref.load %arg1[%15, %c3] : memref<8x4xi32, #tpu.memory_space<smem>>
    %17 = arith.index_cast %16 : i32 to index
    %c0_4 = arith.constant 0 : index
    %18 = vector.load %arg2[%17, %c0_4] : memref<32x384xf32, #tpu.memory_space<vmem>>, vector<1x384xf32>
    %cst = arith.constant 0.000000e+00 : f32
    %19 = vector.broadcast %cst : f32 to vector<4x384xf32>
    %20 = tpu.concatenate %6, %10, %14, %18, %19 in 0 : vector<1x384xf32>, vector<1x384xf32>, vector<1x384xf32>, vector<1x384xf32>, vector<4x384xf32> -> vector<8x384xf32>
    %c0_5 = arith.constant 0 : index
    %c0_6 = arith.constant 0 : index
    %21 = vector.load %arg11[%c0_5, %c0_6] : memref<8x128xf32, #tpu.memory_space<vmem>>, vector<8x128xf32>
    %c0_7 = arith.constant 0 : index
    %c0_8 = arith.constant 0 : index
    %22 = vector.load %arg3[%c0_7, %c0_8] : memref<128x384xf32, #tpu.memory_space<vmem>>, vector<128x384xf32>
    %cst_9 = arith.constant dense<0.000000e+00> : vector<8x384xf32>
    %23 = tpu.matmul %21, %22, %cst_9 {dimension_numbers = #tpu.dot_dimension_numbers<[1], [0], [0], [1], [0, 0, 1, 1], [], []>} : vector<8x128xf32>, vector<128x384xf32>, vector<8x384xf32> -> vector<8x384xf32>
    %24 = vector.extract_strided_slice %20 {offsets = [0, 0], sizes = [8, 128], strides = [1, 1]} : vector<8x384xf32> to vector<8x128xf32>
    %25 = vector.extract_strided_slice %23 {offsets = [0, 0], sizes = [8, 128], strides = [1, 1]} : vector<8x384xf32> to vector<8x128xf32>
    %26 = arith.addf %24, %25 : vector<8x128xf32>
    %27 = arith.negf %26 : vector<8x128xf32>
    %28 = math.exp %27 : vector<8x128xf32>
    %cst_10 = arith.constant 1.000000e+00 : f32
    %29 = vector.broadcast %cst_10 : f32 to vector<8x128xf32>
    %30 = arith.addf %29, %28 : vector<8x128xf32>
    %31 = arith.divf %29, %30 : vector<8x128xf32>
    %32 = vector.extract_strided_slice %20 {offsets = [0, 128], sizes = [8, 128], strides = [1, 1]} : vector<8x384xf32> to vector<8x128xf32>
    %33 = vector.extract_strided_slice %23 {offsets = [0, 128], sizes = [8, 128], strides = [1, 1]} : vector<8x384xf32> to vector<8x128xf32>
    %34 = arith.addf %32, %33 : vector<8x128xf32>
    %35 = arith.negf %34 : vector<8x128xf32>
    %36 = math.exp %35 : vector<8x128xf32>
    %cst_11 = arith.constant 1.000000e+00 : f32
    %37 = vector.broadcast %cst_11 : f32 to vector<8x128xf32>
    %38 = arith.addf %37, %36 : vector<8x128xf32>
    %39 = arith.divf %37, %38 : vector<8x128xf32>
    %40 = vector.extract_strided_slice %20 {offsets = [0, 256], sizes = [8, 128], strides = [1, 1]} : vector<8x384xf32> to vector<8x128xf32>
    %41 = vector.extract_strided_slice %23 {offsets = [0, 256], sizes = [8, 128], strides = [1, 1]} : vector<8x384xf32> to vector<8x128xf32>
    %c0_12 = arith.constant 0 : index
    %c0_13 = arith.constant 0 : index
    %42 = vector.load %arg4[%c0_12, %c0_13] : memref<8x128xf32, #tpu.memory_space<vmem>>, vector<8x128xf32>
    %43 = arith.addf %41, %42 : vector<8x128xf32>
    %44 = arith.mulf %31, %43 : vector<8x128xf32>
    %45 = arith.addf %40, %44 : vector<8x128xf32>
    %46 = math.tanh %45 : vector<8x128xf32>
    %47 = arith.subf %21, %46 : vector<8x128xf32>
    %48 = arith.mulf %39, %47 : vector<8x128xf32>
    %49 = arith.addf %46, %48 : vector<8x128xf32>
    %c0_14 = arith.constant 0 : index
    %c0_15 = arith.constant 0 : index
    %50 = vector.load %arg5[%c0_14, %c0_15] : memref<8x1xi32, #tpu.memory_space<vmem>>, vector<8x1xi32>
    %51 = vector.broadcast %arg0 : i32 to vector<8x1xi32>
    %52 = arith.cmpi sgt, %50, %51 : vector<8x1xi32>
    %53 = vector.shape_cast %52 : vector<8x1xi1> to vector<8x1xi1>
    %54 = vector.broadcast %53 : vector<8x1xi1> to vector<8x128xi1>
    %55 = arith.select %54, %49, %21 : vector<8x128xi1>, vector<8x128xf32>
    %c0_16 = arith.constant 0 : index
    %c0_17 = arith.constant 0 : index
    %56 = vector.load %arg11[%c0_16, %c0_17] : memref<8x128xf32, #tpu.memory_space<vmem>>, vector<8x128xf32>
    tpu.vector_store %arg11[%c0_16, %c0_17], %55 {strides = array<i32>} : memref<8x128xf32, #tpu.memory_space<vmem>>, vector<8x128xf32>,
    %c7_i32 = arith.constant 7 : i32
    %57 = arith.cmpi eq, %arg0, %c7_i32 : i32
    %58 = arith.extui %57 : i1 to i32
    %c0_i32_18 = arith.constant 0 : i32
    %59 = arith.cmpi ne, %58, %c0_i32_18 : i32
    scf.if %59 {
      %60 = vector.extract_strided_slice %55 {offsets = [0, 0], sizes = [2, 128], strides = [1, 1]} : vector<8x128xf32> to vector<2x128xf32>
      %61 = vector.extract_strided_slice %55 {offsets = [2, 0], sizes = [2, 128], strides = [1, 1]} : vector<8x128xf32> to vector<2x128xf32>
      %62 = arith.mulf %60, %61 : vector<2x128xf32>
      %63 = arith.subf %60, %61 : vector<2x128xf32>
      %64 = tpu.concatenate %60, %61, %62, %63 in 1 : vector<2x128xf32>, vector<2x128xf32>, vector<2x128xf32>, vector<2x128xf32> -> vector<2x512xf32>
      %c0_19 = arith.constant 0 : index
      %c0_20 = arith.constant 0 : index
      %65 = vector.load %arg6[%c0_19, %c0_20] : memref<512x128xf32, #tpu.memory_space<vmem>>, vector<512x128xf32>
      %cst_21 = arith.constant dense<0.000000e+00> : vector<2x128xf32>
      %66 = tpu.matmul %64, %65, %cst_21 {dimension_numbers = #tpu.dot_dimension_numbers<[1], [0], [0], [1], [0, 0, 1, 1], [], []>} : vector<2x512xf32>, vector<512x128xf32>, vector<2x128xf32> -> vector<2x128xf32>
      %c0_22 = arith.constant 0 : index
      %c0_23 = arith.constant 0 : index
      %67 = vector.load %arg7[%c0_22, %c0_23] : memref<1x128xf32, #tpu.memory_space<vmem>>, vector<1x128xf32>
      %68 = vector.broadcast %67 : vector<1x128xf32> to vector<2x128xf32>
      %69 = arith.addf %66, %68 : vector<2x128xf32>
      %cst_24 = arith.constant 0.000000e+00 : f32
      %70 = vector.broadcast %cst_24 : f32 to vector<2x128xf32>
      %71 = arith.maximumf %69, %70 : vector<2x128xf32>
      %c0_25 = arith.constant 0 : index
      %c0_26 = arith.constant 0 : index
      %72 = vector.load %arg8[%c0_25, %c0_26] : memref<128x2xf32, #tpu.memory_space<vmem>>, vector<128x2xf32>
      %cst_27 = arith.constant dense<0.000000e+00> : vector<2x2xf32>
      %73 = tpu.matmul %71, %72, %cst_27 {dimension_numbers = #tpu.dot_dimension_numbers<[1], [0], [0], [1], [0, 0, 1, 1], [], []>} : vector<2x128xf32>, vector<128x2xf32>, vector<2x2xf32> -> vector<2x2xf32>
      %c0_28 = arith.constant 0 : index
      %c0_29 = arith.constant 0 : index
      %74 = vector.load %arg9[%c0_28, %c0_29] : memref<1x2xf32, #tpu.memory_space<vmem>>, vector<1x2xf32>
      %75 = vector.broadcast %74 : vector<1x2xf32> to vector<2x2xf32>
      %76 = arith.addf %73, %75 : vector<2x2xf32>
      %c0_30 = arith.constant 0 : index
      %c0_31 = arith.constant 0 : index
      %77 = vector.load %arg10[%c0_30, %c0_31] : memref<2x2xf32, #tpu.memory_space<vmem>>, vector<2x2xf32>
      tpu.vector_store %arg10[%c0_30, %c0_31], %76 {strides = array<i32>} : memref<2x2xf32, #tpu.memory_space<vmem>>, vector<2x2xf32>,
    } else {
    }
    return
  }
  func.func @transform_0(%arg0: i32, %arg1: memref<8x4xi32, #tpu.memory_space<smem>>) -> (i32, i32) {
    %c0_i32 = arith.constant 0 : i32
    %c0_i32_0 = arith.constant 0 : i32
    %c0_i32_1 = arith.constant 0 : i32
    return %c0_i32, %c0_i32_0 : i32, i32
  }
  func.func @transform_1(%arg0: i32, %arg1: memref<8x4xi32, #tpu.memory_space<smem>>) -> (i32, i32) {
    %c0_i32 = arith.constant 0 : i32
    %c0_i32_0 = arith.constant 0 : i32
    %c0_i32_1 = arith.constant 0 : i32
    return %c0_i32, %c0_i32_0 : i32, i32
  }
  func.func @transform_2(%arg0: i32, %arg1: memref<8x4xi32, #tpu.memory_space<smem>>) -> (i32, i32) {
    %c0_i32 = arith.constant 0 : i32
    %c0_i32_0 = arith.constant 0 : i32
    %c0_i32_1 = arith.constant 0 : i32
    return %c0_i32, %c0_i32_0 : i32, i32
  }
  func.func @transform_3(%arg0: i32, %arg1: memref<8x4xi32, #tpu.memory_space<smem>>) -> (i32, i32) {
    %c0_i32 = arith.constant 0 : i32
    %c0_i32_0 = arith.constant 0 : i32
    %c0_i32_1 = arith.constant 0 : i32
    return %c0_i32, %c0_i32_0 : i32, i32
  }
  func.func @transform_4(%arg0: i32, %arg1: memref<8x4xi32, #tpu.memory_space<smem>>) -> (i32, i32) {
    %c0_i32 = arith.constant 0 : i32
    %c0_i32_0 = arith.constant 0 : i32
    %c0_i32_1 = arith.constant 0 : i32
    return %c0_i32, %c0_i32_0 : i32, i32
  }
  func.func @transform_5(%arg0: i32, %arg1: memref<8x4xi32, #tpu.memory_space<smem>>) -> (i32, i32) {
    %c0_i32 = arith.constant 0 : i32
    %c0_i32_0 = arith.constant 0 : i32
    %c0_i32_1 = arith.constant 0 : i32
    return %c0_i32, %c0_i32_0 : i32, i32
  }
  func.func @transform_6(%arg0: i32, %arg1: memref<8x4xi32, #tpu.memory_space<smem>>) -> (i32, i32) {
    %c0_i32 = arith.constant 0 : i32
    %c0_i32_0 = arith.constant 0 : i32
    %c0_i32_1 = arith.constant 0 : i32
    return %c0_i32, %c0_i32_0 : i32, i32
  }
  func.func @transform_7(%arg0: i32, %arg1: memref<8x4xi32, #tpu.memory_space<smem>>) -> (i32, i32) {
    %c0_i32 = arith.constant 0 : i32
    %c0_i32_0 = arith.constant 0 : i32
    %c0_i32_1 = arith.constant 0 : i32
    return %c0_i32, %c0_i32_0 : i32, i32
  }
  func.func @transform_8(%arg0: i32, %arg1: memref<8x4xi32, #tpu.memory_space<smem>>) -> (i32, i32) {
    %c0_i32 = arith.constant 0 : i32
    %c0_i32_0 = arith.constant 0 : i32
    %c0_i32_1 = arith.constant 0 : i32
    return %c0_i32, %c0_i32_0 : i32, i32
  }
}

</mosaic_0001>

<bundles_post_ra>
// kernel: two_parallel_rnns_forward.1
= control target key start
LH: loop header
LB: loop body
LE: loop exit
PB: predicated region body
PF: predicated region fallthrough
CT: control target
= control target key end

     0   :  { %s1964_s0 = inlined_call_operand.vmem [shape: s32[8,4], index: 0, kind: input, shape index: {}]   ;;  %s1965_s1 = inlined_call_operand.vmem [shape: f32[32,384], index: 1, kind: input, shape index: {}]   ;;  %s1966_s2 = inlined_call_operand.vmem [shape: f32[128,384], index: 2, kind: input, shape index: {}]   ;;  %s1967_s3 = inlined_call_operand.vmem [shape: f32[8,128], index: 3, kind: input, shape index: {}]   ;;  %s1968_s4 = inlined_call_operand.vmem [shape: s32[8,1], index: 4, kind: input, shape index: {}]   ;;  %s1969_s5 = inlined_call_operand.vmem [shape: f32[512,128], index: 5, kind: input, shape index: {}]   ;;  %s1970_s6 = inlined_call_operand.vmem [shape: f32[1,128], index: 6, kind: input, shape index: {}]   ;;  %s1971_s7 = inlined_call_operand.vmem [shape: f32[128,2], index: 7, kind: input, shape index: {}]   ;;  %s1972_s8 = inlined_call_operand.vmem [shape: f32[1,2], index: 8, kind: input, shape index: {}]   ;;  %s1973_s9 = inlined_call_operand.hbm [shape: f32[2,2], index: 9, kind: output, shape index: {}]  }
   0x1   :  { %1974 = sst [smem:[#allocation9_spill]] %s1966_s2  ;;  %s14_s11 = sshll.u32 %s1964_s0, 4  ;;  %s15_s11 = int_to_ptr.vmem [resolvable:$true] %s14_s11 }
   0x2   :  { %1975 = sst [smem:[#allocation10_spill]] %s1968_s4  ;;  %s1363_s12 = scalar_lea.vmem %s15_s11, 128 }
   0x3   :  { %p1364_p0 = scmp.ne.s32.totalorder %s15_s11, %s1363_s12  ;;  %p1368_p1 = scmp.lt.s32.totalorder %s15_s11, %s15_s11 }
   0x4   :  { %p1369_p2 = scmp.lt.s32.totalorder %s1363_s12, %s1363_s12 }
   0x6   :  { %p1370_p3 = por %p1369_p2, %p1368_p1 }
   0x8   :  { %p1371_p4 = pnand %p1370_p3, %p1364_p0 }
   0xa   :  { %1374 = shalt.err (!%p1371_p4)  }
   0xb   :  { %s1415_s13 = smov [#allocation4]  }
   0xc   :  { %17 = dma.vmem_to_smem %s15_s11, 128, %s1415_s13, [#allocation3] }
   0xd   :  { %1405 = dma.done.wait [#allocation3], 128 }
   0xe   :  { %1406 = vsyncadd [#allocation3], 4294967168 }
   0xf   :  { %19 = sfence }
  0x10   :  { %20 = vsyncpa [#allocation6], 0  ;;  %s1478_s14 = smov 0  }
  0x11 LB: > { %s1484_s0 = sadd.s32 4294967295, %s1413_s14   ;;  %p994_p5 = scmp.ge.s32.totalorder %s1413_s14, 1  ;;  %s1413_s14 = sphi %s1478_s14, %s26_s14  }
  0x12   : > { %p255_p6 = scmp.lt.s32.totalorder %s1413_s14, 9 }
  0x14   : > { %p256_p7 = pnand %p994_p5, %p255_p6 }
  0x15   : > { %p995_p8 = scmp.ne.s32.totalorder (!%p256_p7), %s1484_s0, 0 }
  0x16   : > { %259 = sbr.rel (%p256_p7) target bundleno = 813 (0x32d), region = 52 }
  0x1d   : > { %282 = sbr.rel (%p995_p8) target bundleno = 36 (0x24), region = 56  ;;  %v1416_v0 = vmov (!%p995_p8), 0.0  }
  0x1e   : > { %283 = vst [vmem:[#allocation2] sm:$0xff] (!%p995_p8), %v1416_v0 }
  0x24 PF: > { %s1976_s2 = sld [smem:[#allocation9_spill]]  ;;  %v1417_v8 = vmov 0.0|0.0   ;;  %v1418_v9 = vmov 0.0   ;;  %vm1419_vm0 = vmmov 0   ;;  %v1420_v15 = vmov 0   ;;  %s1977_s4 = sld [smem:[#allocation10_spill]] }
  0x25   : > { %1216 = vmatprep.subr.bf16.mxu1 %v1417_v8  ;;  %521 = vmatprep.mubr.f32.mxu0 %v1418_v9  ;;  %v621_v43 = vstv %s1484_s0  ;;  %s996_s12 = sshll.u32 %s1484_s0, 7  ;;  %vm392_vm2 = vcmask 1040384   ;;  %vm396_vm3 = vcmask 1041408   ;;  %vm400_vm4 = vcmask 1042432   ;;  %p1003_p9 = scmp.ne.s32.totalorder %s1484_s0, 7 }
  0x26   : > { %1146 = vmatprep.mubr.msk.f32.mxu1 %vm1419_vm0, %v1418_v9  ;;  %1352 = vset.pattern.permute.xlu0 %v1420_v15  ;;  %s295_s13 = sadd.s32 1, %s996_s12  ;;  %s285_s15 = sld [smem:[#allocation4 + %s996_s12]]  ;;  %vm404_vm5 = vcmask 1043456   ;;  %vm1422_vm7 = vmmov (!%p1003_p9), 0   ;;  %vm944_vm8 = vcmask (!%p1003_p9), 9216  }
  0x27   : > { %s296_s16 = sld [smem:[#allocation4 + %s295_s13]]  ;;  %s306_s17 = sadd.s32 2, %s996_s12 }
  0x28   : > { %s307_s18 = sld [smem:[#allocation4 + %s306_s17]]  ;;  %s317_s19 = sadd.s32 3, %s996_s12 }
  0x29   : > { %s318_s22 = sld [smem:[#allocation4 + %s317_s19]] }
  0x2a   : > { %v410_v1 = vld [vmem:[%s1976_s2 + $0x8] sm:$0xff]  ;;  %v413_v2 = vld [vmem:[%s1976_s2 + $0x20] sm:$0xff]  ;;  %v412_v5 = vld [vmem:[%s1976_s2 + $0x18] sm:$0xff] }
  0x2b   : > { %v409_v3 = vld [vmem:[%s1976_s2] sm:$0xff]  ;;  %v1184_v4 = vpack.c.bf16 %v413_v2, %v410_v1  ;;  %v416_v6 = vld [vmem:[%s1976_s2 + $0x38] sm:$0xff]  ;;  %v419_v7 = vld [vmem:[%s1976_s2 + $0x50] sm:$0xff] }
  0x2c   : > { %v1186_v10 = vpack.c.bf16 %v412_v5, %v409_v3  ;;  %v1188_v11 = vpack.c.bf16 %v419_v7, %v416_v6  ;;  %v415_v12 = vld [vmem:[%s1976_s2 + $0x30] sm:$0xff]  ;;  %v418_v13 = vld [vmem:[%s1976_s2 + $0x48] sm:$0xff]  ;;  %v425_v16 = vld [vmem:[%s1976_s2 + $0x80] sm:$0xff]  ;;  %s286_s20 = sshra.s32 %s285_s15, 3  ;;  %s289_s25 = sand.u32 7, %s285_s15 }
  0x2d   : > { %v422_v14 = vld [vmem:[%s1976_s2 + $0x68] sm:$0xff]  ;;  %1185 = vmatprep.subr.bf16.mxu0 %v1184_v4  ;;  %v1190_v17 = vpack.c.bf16 %v418_v13, %v415_v12  ;;  %v421_v19 = vld [vmem:[%s1976_s2 + $0x60] sm:$0xff]  ;;  %v424_v20 = vld [vmem:[%s1976_s2 + $0x78] sm:$0xff]  ;;  %s297_s21 = sshra.s32 %s296_s16, 3  ;;  %s997_s23 = smul.u32 24, %s286_s20 }
  0x2e   : > { %1187 = vmatpush1.bf16.msra.mxu0 %v1186_v10  ;;  %v1192_v18 = vpack.c.bf16 %v425_v16, %v422_v14  ;;  %v428_v21 = vld [vmem:[%s1976_s2 + $0x98] sm:$0xff]  ;;  %v431_v22 = vld [vmem:[%s1976_s2 + $0xb0] sm:$0xff]  ;;  %v1194_v23 = vpack.c.bf16 %v424_v20, %v421_v19  ;;  %v430_v26 = vld [vmem:[%s1976_s2 + $0xa8] sm:$0xff]  ;;  %s998_s24 = smul.u32 24, %s297_s21  ;;  %s300_s26 = sand.u32 7, %s296_s16 }
  0x2f   : > { %1189 = vmatprep.subr.bf16.mxu0 %v1188_v11  ;;  %v427_v24 = vld [vmem:[%s1976_s2 + $0x90] sm:$0xff]  ;;  %v1196_v25 = vpack.c.bf16 %v431_v22, %v428_v21  ;;  %v414_v28 = vld [vmem:[%s1976_s2 + $0x28] sm:$0xff]  ;;  %v437_v30 = vld [vmem:[%s1976_s2 + $0xe0] sm:$0xff]  ;;  %s308_s27 = sshra.s32 %s307_s18, 3  ;;  %s292_s28 = sadd.s32 %s997_s23, %s289_s25 }
  0x30   : > { %v411_v27 = vld [vmem:[%s1976_s2 + $0x10] sm:$0xff]  ;;  %v434_v29 = vld [vmem:[%s1976_s2 + $0xc8] sm:$0xff]  ;;  %v417_v32 = vld [vmem:[%s1976_s2 + $0x40] sm:$0xff]  ;;  %v1198_v34 = vpack.c.bf16 %v430_v26, %v427_v24  ;;  %s303_s29 = sadd.s32 %s998_s24, %s300_s26  ;;  %s999_s30 = smul.u32 24, %s308_s27 }
  0x31   : > { %v1217_v31 = vpack.c.bf16 %v414_v28, %v411_v27  ;;  %v420_v33 = vld [vmem:[%s1976_s2 + $0x58] sm:$0xff]  ;;  %v433_v35 = vld [vmem:[%s1976_s2 + $0xc0] sm:$0xff]  ;;  %v1200_v37 = vpack.c.bf16 %v437_v30, %v434_v29  ;;  %v423_v39 = vld [vmem:[%s1976_s2 + $0x70] sm:$0xff]  ;;  %s319_s10 = sshra.s32 %s318_s22, 3  ;;  %s311_s11 = sand.u32 7, %s307_s18 }
  0x32   : > { %1191 = vmatpush1.bf16.msra.mxu0 %v1190_v17  ;;  %v1220_v36 = vpack.c.bf16 %v420_v33, %v417_v32  ;;  %v436_v38 = vld [vmem:[%s1976_s2 + $0xd8] sm:$0xff]  ;;  %v426_v40 = vld [vmem:[%s1976_s2 + $0x88] sm:$0xff]  ;;  %v443_v42 = vld [vmem:[%s1976_s2 + $0x110] sm:$0xff]  ;;  %v329_v17 = vlaneseq  ;;  %s293_s13 = scalar_lea.vmem %s1965_s1, %s292_s28  ;;  %s304_s19 = scalar_lea.vmem %s1965_s1, %s303_s29 }
  0x33   : > { %1193 = vmatprep.subr.bf16.mxu0 %v1192_v18  ;;  %1218 = vmatpush3.bf16.msra.mxu1 %v1217_v31  ;;  %v440_v41 = vld [vmem:[%s1976_s2 + $0xf8] sm:$0xff]  ;;  %v1202_v44 = vpack.c.bf16 %v436_v38, %v433_v35  ;;  %v439_v45 = vld [vmem:[%s1976_s2 + $0xf0] sm:$0xff]  ;;  %v1223_v46 = vpack.c.bf16 %v426_v40, %v423_v39  ;;  %v620_v47 = vld [vmem:[%s1977_s4] sm:$0xff]  ;;  %s1000_s20 = smul.u32 24, %s319_s10  ;;  %s314_s21 = sadd.s32 %s999_s30, %s311_s11 }
  0x34   : > { %1219 = vmatprep.subr.bf16.mxu1 %v1417_v8  ;;  %v1204_v48 = vpack.c.bf16 %v443_v42, %v440_v41  ;;  %v442_v49 = vld [vmem:[%s1976_s2 + $0x108] sm:$0xff]  ;;  %v429_v50 = vld [vmem:[%s1976_s2 + $0xa0] sm:$0xff]  ;;  %v432_v51 = vld [vmem:[%s1976_s2 + $0xb8] sm:$0xff]  ;;  %vm622_vm1 = vcmp.gt.s32.totalorder %v620_v47, %v621_v43  ;;  %s322_s15 = sand.u32 7, %s318_s22  ;;  %s315_s24 = scalar_lea.vmem %s1965_s1, %s314_s21 }
  0x35   : > { %v446_v52 = vld [vmem:[%s1976_s2 + $0x128] sm:$0xff]  ;;  %v449_v53 = vld [vmem:[%s1976_s2 + $0x140] sm:$0xff]  ;;  %v623_v54 = vsel %vm622_vm1, 1, %v1420_v15  ;;  %v1206_v55 = vpack.c.bf16 %v442_v49, %v439_v45  ;;  %v1226_v57 = vpack.c.bf16 %v432_v51, %v429_v50  ;;  %v448_v59 = vld [vmem:[%s1976_s2 + $0x138] sm:$0xff]  ;;  %s325_s18 = sadd.s32 %s1000_s20, %s322_s15 }
  0x36   : > { %1195 = vmatpush1.bf16.msra.mxu0 %v1194_v23  ;;  %625 = vperm.xlu0 %1352, %v623_v54   ;;  %v445_v56 = vld [vmem:[%s1976_s2 + $0x120] sm:$0xff]  ;;  %v1208_v58 = vpack.c.bf16 %v449_v53, %v446_v52  ;;  %v435_v60 = vld [vmem:[%s1976_s2 + $0xd0] sm:$0xff]  ;;  %v438_v61 = vld [vmem:[%s1976_s2 + $0xe8] sm:$0xff]  ;;  %s326_s4 = scalar_lea.vmem %s1965_s1, %s325_s18 }
  0x37   : > { %1197 = vmatprep.subr.bf16.mxu0 %v1196_v25  ;;  %1221 = vmatpush3.bf16.msra.mxu1 %v1220_v36  ;;  %v452_v62 = vld [vmem:[%s1976_s2 + $0x158] sm:$0xff]  ;;  %v455_v63 = vld [vmem:[%s1976_s2 + $0x170] sm:$0xff]  ;;  %v1210_v0 = vpack.c.bf16 %v448_v59, %v445_v56  ;;  %v1229_v2 = vpack.c.bf16 %v438_v61, %v435_v60  ;;  %v454_v4 = vld [vmem:[%s1976_s2 + $0x168] sm:$0xff] }
  0x38   : > { %1222 = vmatprep.subr.bf16.mxu1 %v1417_v8  ;;  %v451_v1 = vld [vmem:[%s1976_s2 + $0x150] sm:$0xff]  ;;  %v1212_v3 = vpack.c.bf16 %v455_v63, %v452_v62  ;;  %v441_v5 = vld [vmem:[%s1976_s2 + $0x100] sm:$0xff]  ;;  %v444_v6 = vld [vmem:[%s1976_s2 + $0x118] sm:$0xff] }
  0x39   : > { %v1214_v7 = vpack.c.bf16 %v454_v4, %v451_v1  ;;  %v1232_v9 = vpack.c.bf16 %v444_v6, %v441_v5  ;;  %v447_v10 = vld [vmem:[%s1976_s2 + $0x130] sm:$0xff]  ;;  %v450_v11 = vld [vmem:[%s1976_s2 + $0x148] sm:$0xff]  ;;  %v1637_v12 = vld [vmem:[#allocation2] sm:$0xff] }
  0x3a   : > { %1199 = vmatpush1.bf16.msra.mxu0 %v1198_v34  ;;  %v1235_v13 = vpack.c.bf16 %v450_v11, %v447_v10  ;;  %v453_v14 = vld [vmem:[%s1976_s2 + $0x160] sm:$0xff]  ;;  %v456_v15 = vld [vmem:[%s1976_s2 + $0x178] sm:$0xff]  ;;  %v656_v11 = vld [vmem:[%s1969_s5 + $0x88] sm:$0xff] (!%p1003_p9) }
  0x3b   : > { %1201 = vmatprep.subr.bf16.mxu0 %v1200_v37  ;;  %1224 = vmatpush3.bf16.msra.mxu1 %v1223_v46  ;;  %v1238_v16 = vpack.c.bf16 %v456_v15, %v453_v14  ;;  %v294_v19 = vld [vmem:[%s293_s13] ss:$8 sm:$0x7] }
  0x3c   : > { %1225 = vmatprep.subr.bf16.mxu1 %v1417_v8  ;;  %v305_v20 = vld [vmem:[%s304_s19] ss:$8 sm:$0x7] }
  0x3d   : > { %v316_v21 = vld [vmem:[%s315_s24] ss:$8 sm:$0x7] }
  0x3e   : > { %1203 = vmatpush1.bf16.msra.mxu0 %v1202_v44  ;;  %v327_v24 = vld [vmem:[%s326_s4] ss:$8 sm:$0x7] }
  0x3f   : > { %1205 = vmatprep.subr.bf16.mxu0 %v1204_v48  ;;  %1227 = vmatpush3.bf16.msra.mxu1 %v1226_v57  ;;  %v612_v57 = vld [vmem:[%s1967_s3] sm:$0xff]  ;;  %v640_v15 = vld [vmem:[%s1969_s5 + $0x8] sm:$0xff] (!%p1003_p9) }
  0x40   : > { %1228 = vmatprep.subr.bf16.mxu1 %v1417_v8  ;;  %v655_v10 = vld [vmem:[%s1969_s5 + $0x80] sm:$0xff] (!%p1003_p9) }
  0x41   : > { %v1240_v14 = vpack.c.bf16 (!%p1003_p9), %v656_v11, %v655_v10  ;;  %v698_v10 = vld [vmem:[%s1969_s5 + $0x1d8] sm:$0xff] (!%p1003_p9) }
  0x42   : > { %1207 = vmatpush1.bf16.msra.mxu0 %v1206_v55 }
  0x43   : > { %1209 = vmatprep.subr.bf16.mxu0 %v1208_v58  ;;  %1230 = vmatpush3.bf16.msra.mxu1 %v1229_v2 }
  0x44   : > { %1231 = vmatprep.subr.bf16.mxu1 %v1417_v8 }
  0x46   : > { %1211 = vmatpush1.bf16.msra.mxu0 %v1210_v0 }
  0x47   : > { %1213 = vmatprep.subr.bf16.mxu0 %v1212_v3  ;;  %1233 = vmatpush3.bf16.msra.mxu1 %v1232_v9 }
  0x48   : > { %1234 = vmatprep.subr.bf16.mxu1 %v1417_v8 }
  0x4a   : > { %1215 = vmatpush1.bf16.msra.mxu0 %v1214_v7 }
  0x4b   : > { %1236 = vmatpush3.bf16.msra.mxu1 %v1235_v13  ;;  %v639_v13 = vld [vmem:[%s1969_s5] sm:$0xff] (!%p1003_p9)  ;;  %1241 = vmatprep.subr.bf16.mxu0 (!%p1003_p9), %v1240_v14 }
  0x4c   : > { %1237 = vmatprep.subr.bf16.mxu1 %v1417_v8  ;;  %v330_v8 = vshrl.u32 %v329_v17, 7  ;;  %v688_v17 = vld [vmem:[%s1969_s5 + $0x188] sm:$0xff] (!%p1003_p9) }
  0x4d   : > { %522 = vmatmul.mubr.f32.vlgmr.msra.gmra.mrb[0].mxu0 %v1637_v12 }
  0x4e   : > { %v331_v18 = vsub.s32 0, %v330_v8  ;;  %v335_v27 = vsub.s32 1, %v330_v8  ;;  %v339_v47 = vsub.s32 2, %v330_v8  ;;  %v1242_v8 = vpack.c.bf16 (!%p1003_p9), %v640_v15, %v639_v13  ;;  %v649_v15 = vld [vmem:[%s1969_s5 + $0x50] sm:$0xff] (!%p1003_p9) }
  0x4f   : > { %1239 = vmatpush3.bf16.msra.mxu1 %v1238_v16  ;;  %v687_v16 = vld [vmem:[%s1969_s5 + $0x180] sm:$0xff] (!%p1003_p9) }
  0x50   : > { %v332_v22 = vrot.slane %v294_v19, %v331_v18  ;;  %v348_v23 = vrot.slane %v305_v20, %v331_v18  ;;  %v364_v25 = vrot.slane %v316_v21, %v331_v18  ;;  %v380_v28 = vrot.slane %v327_v24, %v331_v18  ;;  %1243 = vmatpush3.bf16.msra.mxu0 (!%p1003_p9), %v1242_v8 }
  0x51   : > { %v336_v30 = vrot.slane %v294_v19, %v335_v27  ;;  %v352_v31 = vrot.slane %v305_v20, %v335_v27  ;;  %v368_v33 = vrot.slane %v316_v21, %v335_v27  ;;  %v384_v36 = vrot.slane %v327_v24, %v335_v27 }
  0x52   : > { %1147 = vmatmul.mubr.f32.vlgmr.msra.gmra.mrb[0].mxu1 %v1637_v12  ;;  %v393_v26 = vsel %vm392_vm2, %v332_v22, %v348_v23  ;;  %v340_v50 = vrot.slane %v294_v19, %v339_v47  ;;  %v356_v51 = vrot.slane %v305_v20, %v339_v47  ;;  %v372_v53 = vrot.slane %v316_v21, %v339_v47  ;;  %v671_v19 = vld [vmem:[%s1969_s5 + $0x100] sm:$0xff] (!%p1003_p9)  ;;  %v672_v20 = vld [vmem:[%s1969_s5 + $0x108] sm:$0xff] (!%p1003_p9)  ;;  %v657_v21 = vld [vmem:[%s1969_s5 + $0x90] sm:$0xff] (!%p1003_p9) }
  0x53   : > { %v397_v29 = vsel %vm396_vm3, %v393_v26, %v364_v25  ;;  %v394_v34 = vsel %vm392_vm2, %v336_v30, %v352_v31  ;;  %v388_v55 = vrot.slane %v327_v24, %v339_v47  ;;  %v1272_v18 = vpack.c.bf16 (!%p1003_p9), %v688_v17, %v687_v16  ;;  %v658_v24 = vld [vmem:[%s1969_s5 + $0x98] sm:$0xff] (!%p1003_p9)  ;;  %v641_v25 = vld [vmem:[%s1969_s5 + $0x10] sm:$0xff] (!%p1003_p9) }
  0x54   : > { %v401_v32 = vsel %vm400_vm4, %v397_v29, %v380_v28  ;;  %v398_v38 = vsel %vm396_vm3, %v394_v34, %v368_v33  ;;  %v395_v54 = vsel %vm392_vm2, %v340_v50, %v356_v51  ;;  %v1274_v23 = vpack.c.bf16 (!%p1003_p9), %v672_v20, %v671_v19  ;;  %v642_v26 = vld [vmem:[%s1969_s5 + $0x18] sm:$0xff] (!%p1003_p9)  ;;  %v689_v29 = vld [vmem:[%s1969_s5 + $0x190] sm:$0xff] (!%p1003_p9)  ;;  %v659_v34 = vld [vmem:[%s1969_s5 + $0xa0] sm:$0xff] (!%p1003_p9) }
  0x55   : > { %v405_v35 = vsel %vm404_vm5, %v401_v32, 0.0  ;;  %v402_v42 = vsel %vm400_vm4, %v398_v38, %v384_v36  ;;  %v399_v56 = vsel %vm396_vm3, %v395_v54, %v372_v53  ;;  %1273 = vmatprep.subr.bf16.mxu1 (!%p1003_p9), %v1272_v18  ;;  %v1244_v27 = vpack.c.bf16 (!%p1003_p9), %v658_v24, %v657_v21  ;;  %v690_v30 = vld [vmem:[%s1969_s5 + $0x198] sm:$0xff] (!%p1003_p9)  ;;  %v673_v31 = vld [vmem:[%s1969_s5 + $0x110] sm:$0xff] (!%p1003_p9)  ;;  %v643_v38 = vld [vmem:[%s1969_s5 + $0x20] sm:$0xff] (!%p1003_p9) }
  0x56   : > { %v406_v43 = vsel %vm404_vm5, %v402_v42, 0.0  ;;  %v403_v58 = vsel %vm400_vm4, %v399_v56, %v388_v55  ;;  %v1246_v28 = vpack.c.bf16 (!%p1003_p9), %v642_v26, %v641_v25  ;;  %1275 = vmatpush3.bf16.msra.mxu1 (!%p1003_p9), %v1274_v23  ;;  %v1276_v32 = vpack.c.bf16 (!%p1003_p9), %v690_v30, %v689_v29  ;;  %v674_v33 = vld [vmem:[%s1969_s5 + $0x118] sm:$0xff] (!%p1003_p9)  ;;  %v675_v42 = vld [vmem:[%s1969_s5 + $0x120] sm:$0xff] (!%p1003_p9)  ;;  %v677_v55 = vld [vmem:[%s1969_s5 + $0x130] sm:$0xff] (!%p1003_p9) }
  0x57   : > { %v407_v62 = vsel %vm404_vm5, %v403_v58, 0.0  ;;  %1245 = vmatprep.subr.bf16.mxu0 (!%p1003_p9), %v1244_v27  ;;  %v1278_v36 = vpack.c.bf16 (!%p1003_p9), %v674_v33, %v673_v31  ;;  %v662_v47 = vld [vmem:[%s1969_s5 + $0xb8] sm:$0xff] (!%p1003_p9)  ;;  %v664_v58 = vld [vmem:[%s1969_s5 + $0xc8] sm:$0xff] (!%p1003_p9)  ;;  %v681_v17 = vld [vmem:[%s1969_s5 + $0x150] sm:$0xff] (!%p1003_p9) }
  0x58   : > { %1277 = vmatprep.subr.bf16.mxu1 (!%p1003_p9), %v1276_v32  ;;  %1247 = vmatpush3.bf16.msra.mxu0 (!%p1003_p9), %v1246_v28  ;;  %v646_v51 = vld [vmem:[%s1969_s5 + $0x38] sm:$0xff] (!%p1003_p9)  ;;  %v667_v19 = vld [vmem:[%s1969_s5 + $0xe0] sm:$0xff] (!%p1003_p9)  ;;  %v668_v20 = vld [vmem:[%s1969_s5 + $0xe8] sm:$0xff] (!%p1003_p9) }
  0x59   : > { %v694_v53 = vld [vmem:[%s1969_s5 + $0x1b8] sm:$0xff] (!%p1003_p9)  ;;  %v699_v21 = vld [vmem:[%s1969_s5 + $0x1e0] sm:$0xff] (!%p1003_p9)  ;;  %v1264_v25 = vpack.c.bf16 (!%p1003_p9), %v668_v20, %v667_v19  ;;  %v652_v27 = vld [vmem:[%s1969_s5 + $0x68] sm:$0xff] (!%p1003_p9) }
  0x5a   : > { %1279 = vmatpush3.bf16.msra.mxu1 (!%p1003_p9), %v1278_v36  ;;  %v678_v56 = vld [vmem:[%s1969_s5 + $0x138] sm:$0xff] (!%p1003_p9)  ;;  %v651_v26 = vld [vmem:[%s1969_s5 + $0x60] sm:$0xff] (!%p1003_p9)  ;;  %v684_v30 = vld [vmem:[%s1969_s5 + $0x168] sm:$0xff] (!%p1003_p9) }
  0x5b   : > { %v650_v16 = vld [vmem:[%s1969_s5 + $0x58] sm:$0xff] (!%p1003_p9)  ;;  %v683_v28 = vld [vmem:[%s1969_s5 + $0x160] sm:$0xff] (!%p1003_p9)  ;;  %v669_v31 = vld [vmem:[%s1969_s5 + $0xf0] sm:$0xff] (!%p1003_p9) }
  0x5c   : > { %v682_v18 = vld [vmem:[%s1969_s5 + $0x158] sm:$0xff] (!%p1003_p9)  ;;  %v1262_v23 = vpack.c.bf16 (!%p1003_p9), %v650_v16, %v649_v15  ;;  %v701_v33 = vld [vmem:[%s1969_s5 + $0x1f0] sm:$0xff] (!%p1003_p9)  ;;  %v1298_v36 = vpack.c.bf16 (!%p1003_p9), %v684_v30, %v683_v28 }
  0x5d   : > { %v1294_v24 = vpack.c.bf16 (!%p1003_p9), %v682_v18, %v681_v17  ;;  %v670_v32 = vld [vmem:[%s1969_s5 + $0xf8] sm:$0xff] (!%p1003_p9)  ;;  %v1005_v18 = vld [vmem:[%s1972_s8] ss:$0 sm:$0xff] (!%p1003_p9) }
  0xb5   : > { %v626_v3 = vpop.permute.xlu0 %625 }
  0xb6   : > { %vm627_vm6 = vcmp.eq.s32.totalorder %v626_v3, 1 }
 0x120   : > { %v523_v37 = vpop.f32.mrb[0].mxu0 }
 0x121   : > { %v598_v39 = vadd.f32 %v523_v37, %v405_v35  ;;  %v525_v40 = vpop.f32.mrb[1].mxu0  ;;  %v660_v35 = vld [vmem:[%s1969_s5 + $0xa8] sm:$0xff] (!%p1003_p9) }
 0x122   : > { %v605_v45 = vadd.f32 %v525_v40, %v406_v43  ;;  %v1248_v37 = vpack.c.bf16 (!%p1003_p9), %v660_v35, %v659_v34  ;;  %v691_v40 = vld [vmem:[%s1969_s5 + $0x1a0] sm:$0xff] (!%p1003_p9)  ;;  %v676_v43 = vld [vmem:[%s1969_s5 + $0x128] sm:$0xff] (!%p1003_p9)  ;;  %v702_v34 = vld [vmem:[%s1969_s5 + $0x1f8] sm:$0xff] (!%p1003_p9)  ;;  %v1266_v35 = vpack.c.bf16 (!%p1003_p9), %v652_v27, %v651_v26 }
 0x123   : > { %v1001_v41 = vmul.f32 -1.442695, %v598_v39  ;;  %v644_v39 = vld [vmem:[%s1969_s5 + $0x28] sm:$0xff] (!%p1003_p9) }
 0x124   : > { %v1002_v48 = vmul.f32 -1.442695, %v605_v45  ;;  %1249 = vmatprep.subr.bf16.mxu0 (!%p1003_p9), %v1248_v37  ;;  %v1268_v37 = vpack.c.bf16 (!%p1003_p9), %v670_v32, %v669_v31 }
 0x125   : > { %1353 = vpow2.f32 %v1001_v41  ;;  %v594_v44 = vpop.f32.mrb[0].mxu1  ;;  %v692_v41 = vld [vmem:[%s1969_s5 + $0x1a8] sm:$0xff] (!%p1003_p9) }
 0x126   : > { %v1148_v46 = vpop.f32.mrb[1].mxu1  ;;  %1355 = vpow2.f32 %v1002_v48  ;;  %v613_v59 = vadd.f32 %v612_v57, %v594_v44  ;;  %v1250_v44 = vpack.c.bf16 (!%p1003_p9), %v644_v39, %v643_v38  ;;  %v1280_v45 = vpack.c.bf16 (!%p1003_p9), %v692_v41, %v691_v40  ;;  %v645_v48 = vld [vmem:[%s1969_s5 + $0x30] sm:$0xff] (!%p1003_p9)  ;;  %v663_v57 = vld [vmem:[%s1969_s5 + $0xc0] sm:$0xff] (!%p1003_p9)  ;;  %v654_v39 = vld [vmem:[%s1969_s5 + $0x78] sm:$0xff] (!%p1003_p9) }
 0x127   : > { %v661_v46 = vld [vmem:[%s1969_s5 + $0xb0] sm:$0xff] (!%p1003_p9)  ;;  %v1300_v40 = vpack.c.bf16 (!%p1003_p9), %v702_v34, %v701_v33 }
 0x128   : > { %v1252_v50 = vpack.c.bf16 (!%p1003_p9), %v662_v47, %v661_v46  ;;  %1281 = vmatprep.subr.bf16.mxu1 (!%p1003_p9), %v1280_v45  ;;  %1251 = vmatpush3.bf16.msra.mxu0 (!%p1003_p9), %v1250_v44  ;;  %v653_v38 = vld [vmem:[%s1969_s5 + $0x70] sm:$0xff] (!%p1003_p9)  ;;  %v851_v45 = vld [vmem:[%s1971_s7] sm:$0xff] (!%p1003_p9)  ;;  %v852_v46 = vld [vmem:[%s1971_s7 + $0x8] sm:$0xff] (!%p1003_p9) }
 0x129   : > { %v685_v41 = vld [vmem:[%s1969_s5 + $0x170] sm:$0xff] (!%p1003_p9) }
 0x12a   : > { %1253 = vmatprep.subr.bf16.mxu0 (!%p1003_p9), %v1252_v50  ;;  %v853_v50 = vld [vmem:[%s1971_s7 + $0x10] sm:$0xff] (!%p1003_p9) }
 0x12f   : > { %v1354_v49 = vpop.eup %1353 }
 0x130   : > { %v602_v52 = vadd.f32 1.0, %v1354_v49  ;;  %v1356_v60 = vpop.eup %1355  ;;  %v1282_v49 = vpack.c.bf16 (!%p1003_p9), %v676_v43, %v675_v42  ;;  %v686_v42 = vld [vmem:[%s1969_s5 + $0x178] sm:$0xff] (!%p1003_p9)  ;;  %v1270_v43 = vpack.c.bf16 (!%p1003_p9), %v654_v39, %v653_v38 }
 0x131   : > { %v609_v0 = vadd.f32 1.0, %v1356_v60  ;;  %v695_v60 = vld [vmem:[%s1969_s5 + $0x1c0] sm:$0xff] (!%p1003_p9)  ;;  %v1302_v44 = vpack.c.bf16 (!%p1003_p9), %v686_v42, %v685_v41 }
 0x132   : > { %1357 = vrcp.f32 %v602_v52  ;;  %v693_v52 = vld [vmem:[%s1969_s5 + $0x1b0] sm:$0xff] (!%p1003_p9)  ;;  %1283 = vmatpush3.bf16.msra.mxu1 (!%p1003_p9), %v1282_v49  ;;  %v1421_v49 = vmov (!%p1003_p9), 0.0|0.0  }
 0x133   : > { %v1284_v54 = vpack.c.bf16 (!%p1003_p9), %v694_v53, %v693_v52  ;;  %v856_v53 = vld [vmem:[%s1971_s7 + $0x28] sm:$0xff] (!%p1003_p9) }
 0x135   : > { %1285 = vmatprep.subr.bf16.mxu1 (!%p1003_p9), %v1284_v54 }
 0x13c   : > { %v1358_v61 = vpop.eup %1357 }
 0x13d   : > { %v614_v63 = vmul.f32 %v1358_v61, %v613_v59  ;;  %v1254_v59 = vpack.c.bf16 (!%p1003_p9), %v646_v51, %v645_v48  ;;  %v696_v61 = vld [vmem:[%s1969_s5 + $0x1c8] sm:$0xff] (!%p1003_p9)  ;;  %v1305_v48 = vpack.c.bf16 (!%p1003_p9), %v852_v46, %v851_v45  ;;  %v854_v51 = vld [vmem:[%s1971_s7 + $0x18] sm:$0xff] (!%p1003_p9) }
 0x13e   : > { %v1288_v3 = vpack.c.bf16 (!%p1003_p9), %v696_v61, %v695_v60  ;;  %v1308_v52 = vpack.c.bf16 (!%p1003_p9), %v854_v51, %v853_v50  ;;  %v861_v60 = vld [vmem:[%s1971_s7 + $0x50] sm:$0xff] (!%p1003_p9)  ;;  %v862_v61 = vld [vmem:[%s1971_s7 + $0x58] sm:$0xff] (!%p1003_p9) }
 0x13f   : > { %v615_v1 = vadd.f32 %v614_v63, %v407_v62  ;;  %v1286_v62 = vpack.c.bf16 (!%p1003_p9), %v678_v56, %v677_v55  ;;  %v1256_v63 = vpack.c.bf16 (!%p1003_p9), %v664_v58, %v663_v57  ;;  %1255 = vmatpush3.bf16.msra.mxu0 (!%p1003_p9), %v1254_v59  ;;  %v857_v55 = vld [vmem:[%s1971_s7 + $0x30] sm:$0xff] (!%p1003_p9)  ;;  %v859_v57 = vld [vmem:[%s1971_s7 + $0x40] sm:$0xff] (!%p1003_p9)  ;;  %v860_v58 = vld [vmem:[%s1971_s7 + $0x48] sm:$0xff] (!%p1003_p9) }
 0x140   : > { %v1317_v59 = vpack.c.bf16 (!%p1003_p9), %v860_v58, %v859_v57 }
 0x141   : > { %1359 = vtanh.f32 %v615_v1  ;;  %v648_v1 = vld [vmem:[%s1969_s5 + $0x48] sm:$0xff] (!%p1003_p9)  ;;  %1287 = vmatpush3.bf16.msra.mxu1 (!%p1003_p9), %v1286_v62  ;;  %1257 = vmatprep.subr.bf16.mxu0 (!%p1003_p9), %v1256_v63  ;;  %v1320_v62 = vpack.c.bf16 (!%p1003_p9), %v862_v61, %v861_v60  ;;  %v863_v63 = vld [vmem:[%s1971_s7 + $0x60] sm:$0xff] (!%p1003_p9) }
 0x142   : > { %1361 = vrcp.f32 %v609_v0  ;;  %v647_v0 = vld [vmem:[%s1969_s5 + $0x40] sm:$0xff] (!%p1003_p9)  ;;  %1289 = vmatprep.subr.bf16.mxu1 (!%p1003_p9), %v1288_v3  ;;  %v866_v3 = vld [vmem:[%s1971_s7 + $0x78] sm:$0xff] (!%p1003_p9) }
 0x143   : > { %v1258_v11 = vpack.c.bf16 (!%p1003_p9), %v648_v1, %v647_v0  ;;  %v864_v0 = vld [vmem:[%s1971_s7 + $0x68] sm:$0xff] (!%p1003_p9) }
 0x144   : > { %v1323_v1 = vpack.c.bf16 (!%p1003_p9), %v864_v0, %v863_v63 }
 0x145   : > { %1259 = vmatpush3.bf16.msra.mxu0 (!%p1003_p9), %v1258_v11 }
 0x14b   : > { %v1360_v2 = vpop.eup %1359 }
 0x14c   : > { %v617_v4 = vsub.f32 %v1637_v12, %v1360_v2  ;;  %v1362_v5 = vpop.eup %1361 }
 0x14d   : > { %633 = sbr.rel (%p1003_p9) target bundleno = 788 (0x314), region = 60 }
 0x14e   : > { %v618_v6 = vmul.f32 %v1362_v5, %v617_v4  ;;  %v680_v4 = vld [vmem:[%s1969_s5 + $0x148] sm:$0xff] (!%p1003_p9)  ;;  %v665_v5 = vld [vmem:[%s1969_s5 + $0xd0] sm:$0xff] (!%p1003_p9) }
 0x150   : > { %v619_v7 = vadd.f32 %v1360_v2, %v618_v6  ;;  %v679_v2 = vld [vmem:[%s1969_s5 + $0x140] sm:$0xff] (!%p1003_p9)  ;;  %v666_v6 = vld [vmem:[%s1969_s5 + $0xd8] sm:$0xff] (!%p1003_p9) }
 0x151   : > { %v1290_v13 = vpack.c.bf16 (!%p1003_p9), %v680_v4, %v679_v2  ;;  %v1260_v14 = vpack.c.bf16 (!%p1003_p9), %v666_v6, %v665_v5  ;;  %v865_v2 = vld [vmem:[%s1971_s7 + $0x70] sm:$0xff] (!%p1003_p9)  ;;  %v1423_v5 = vmov (!%p1003_p9), 0.0  }
 0x152   : > { %v1679_v9 = vsel %vm627_vm6, %v619_v7, %v1637_v12  ;;  %v697_v7 = vld [vmem:[%s1969_s5 + $0x1d0] sm:$0xff] (!%p1003_p9)  ;;  %v1326_v4 = vpack.c.bf16 (!%p1003_p9), %v866_v3, %v865_v2 }
 0x153   : > { %629 = vst [vmem:[#allocation2] sm:$0xff] %v1679_v9  ;;  %v1693_v12 = vrot.slane (!%p1003_p9), %v1679_v9, 2  ;;  %v1292_v8 = vpack.c.bf16 (!%p1003_p9), %v698_v10, %v697_v7  ;;  %1291 = vmatpush3.bf16.msra.mxu1 (!%p1003_p9), %v1290_v13  ;;  %1261 = vmatprep.subr.bf16.mxu0 (!%p1003_p9), %v1260_v14  ;;  %v1004_v7 = vld [vmem:[%s1970_s6] ss:$0 sm:$0xff] (!%p1003_p9) }
 0x154   : > { %1263 = vmatpush3.bf16.msra.mxu0 %v1262_v23 }
 0x155   : > { %774 = vmatprep.mubr.f32.mxu0 %v1693_v12  ;;  %v638_v22 = vsub.f32 %v1679_v9, %v1693_v12  ;;  %1293 = vmatprep.subr.bf16.mxu1 %v1292_v8  ;;  %v637_v47 = vmul.f32 %v1693_v12, %v1679_v9  ;;  %v855_v12 = vld [vmem:[%s1971_s7 + $0x20] sm:$0xff] }
 0x156   : > { %1265 = vmatprep.subr.bf16.mxu0 %v1264_v25  ;;  %v1311_v54 = vpack.c.bf16 %v856_v53, %v855_v12 }
 0x157   : > { %844 = vmatprep.mubr.f32.mxu1 %v638_v22  ;;  %v700_v22 = vld [vmem:[%s1969_s5 + $0x1e8] sm:$0xff]  ;;  %1295 = vmatpush3.bf16.msra.mxu1 %v1294_v24 }
 0x158   : > { %v1296_v29 = vpack.c.bf16 %v700_v22, %v699_v21  ;;  %1267 = vmatpush3.bf16.msra.mxu0 %v1266_v35 }
 0x159   : > { %1269 = vmatprep.subr.bf16.mxu0 %v1268_v37 }
 0x15a   : > { %1297 = vmatprep.subr.bf16.mxu1 %v1296_v29 }
 0x15b   : > { %1299 = vmatpush3.bf16.msra.mxu1 %v1298_v36 }
 0x15c   : > { %1301 = vmatprep.subr.bf16.mxu1 %v1300_v40  ;;  %1271 = vmatpush3.bf16.msra.mxu0 %v1270_v43 }
 0x15d   : > { %1304 = vmatprep.subr.bf16.mxu0 %v1421_v49 }
 0x15f   : > { %1303 = vmatpush3.bf16.msra.mxu1 %v1302_v44  ;;  %775 = vmatmul.mubr.f32.vlgmr.msra.gmra.mrb[0].mxu0 %v1679_v9  ;;  %v858_v9 = vld [vmem:[%s1971_s7 + $0x38] sm:$0xff] }
 0x160   : > { %1306 = vmatpush3.bf16.msra.mxu0 %v1305_v48  ;;  %v1314_v56 = vpack.c.bf16 %v858_v9, %v857_v55  ;;  %1181 = vmatprep.mubr.msk.f32.mxu0 %vm1422_vm7, %v1423_v5 }
 0x161   : > { %1307 = vmatprep.subr.bf16.mxu0 %v1421_v49 }
 0x162   : > { %845 = vmatmul.mubr.f32.vlgmr.msra.gmra.mrb[0].mxu1 %v637_v47 }
 0x164   : > { %1309 = vmatpush3.bf16.msra.mxu0 %v1308_v52 }
 0x165   : > { %1310 = vmatprep.subr.bf16.mxu0 %v1421_v49 }
 0x168   : > { %1312 = vmatpush3.bf16.msra.mxu0 %v1311_v54 }
 0x169   : > { %1313 = vmatprep.subr.bf16.mxu0 %v1421_v49 }
 0x16c   : > { %1315 = vmatpush3.bf16.msra.mxu0 %v1314_v56 }
 0x16d   : > { %1316 = vmatprep.subr.bf16.mxu0 %v1421_v49 }
 0x170   : > { %1318 = vmatpush3.bf16.msra.mxu0 %v1317_v59 }
 0x171   : > { %1319 = vmatprep.subr.bf16.mxu0 %v1421_v49 }
 0x174   : > { %1321 = vmatpush3.bf16.msra.mxu0 %v1320_v62 }
 0x175   : > { %1322 = vmatprep.subr.bf16.mxu0 %v1421_v49 }
 0x178   : > { %1324 = vmatpush3.bf16.msra.mxu0 %v1323_v1 }
 0x179   : > { %1325 = vmatprep.subr.bf16.mxu0 %v1421_v49 }
 0x17c   : > { %1327 = vmatpush3.bf16.msra.mxu0 %v1326_v4 }
 0x232   : > { %v1059_v6 = vpop.f32.mrb[0].mxu0 }
 0x233   : > { %v1060_v10 = vpop.f32.mrb[1].mxu0 }
 0x234   : > { %v1061_v13 = vadd.f32 %v1060_v10, %v1059_v6 }
 0x235   : > { %v1094_v11 = vpop.f32.mrb[0].mxu1 }
 0x236   : > { %v1095_v14 = vpop.f32.mrb[1].mxu1  ;;  %v777_v16 = vadd.f32 %v1061_v13, %v1004_v7 }
 0x237   : > { %v1096_v15 = vadd.f32 %v1095_v14, %v1094_v11 }
 0x239   : > { %v847_v17 = vadd.f32 %v1096_v15, %v777_v16 }
 0x23b   : > { %v850_v8 = vmax.f32 %v847_v17, 0.0 }
 0x23d   : > { %1182 = vmatmul.mubr.f32.vlgmr.msra.gmra.mrb[2].mxu0 %v850_v8 }
 0x310   : > { %v940_v19 = vpop.f32.mrb[2].mxu0 }
 0x311   : > { %v941_v20 = vadd.f32 %v1005_v18, %v940_v19  ;;  %v1183_v21 = vpop.f32.mrb[3].mxu0 }
 0x313   : > { %945 = vst.msk [vmem:[#allocation5] sm:$0x3] %vm944_vm8, %v941_v20 }
 0x314 PF: > { %p1332_p10 = scmp.eq.s32.totalorder %s1484_s0, 7  ;;  %s1424_s20 = smov [#allocation5]  }
 0x315   : > { %s953_s21 = sshll.u32 %s1424_s20, 4  ;;  %s954_s21 = int_to_ptr.vmem [resolvable:$true] %s953_s21 }
 0x316   : > { %s1375_s15 = scalar_lea.vmem %s954_s21, 32  ;;  %p1382_p0 = scmp.lt.s32.totalorder %s954_s21, %s954_s21 }
 0x317   : > { %p1376_p11 = scmp.ne.s32.totalorder %s954_s21, %s1375_s15  ;;  %p1383_p1 = scmp.lt.s32.totalorder %s1375_s15, %s1375_s15 }
 0x319   : > { %p1377_p12 = pnand %p1376_p11, %p1332_p10  ;;  %p1384_p2 = por %p1383_p1, %p1382_p0 }
 0x31b   : > { %p1378_p13 = pneg %p1377_p12 }
 0x31d   : > { %p1385_p3 = pnand %p1384_p2, %p1378_p13 }
 0x31f   : > { %1388 = shalt.err (!%p1385_p3)
}
 0x320   : > { %s1389_s24 = scalar_lea.hbm %s1973_s9, 32 }
 0x321   : > { %p1390_p4 = scmp.ne.s32.totalorder %s1973_s9, %s1389_s24  ;;  %p1395_p7 = scmp.lt.u32.totalorder %s1389_s24, %s1973_s9 }
 0x323   : > { %p1391_p5 = pnand %p1390_p4, %p1332_p10 }
 0x325   : > { %p1392_p6 = pneg %p1391_p5 }
 0x327   : > { %p1397_p8 = pnand %p1395_p7, %p1392_p6 }
 0x329   : > { %1400 = shalt.err (!%p1397_p8)
}
 0x32a   : > { %1329 = dma.vmem_to_hbm [thread:$0]  (%p1332_p10), %s954_s21, 32, %s1973_s9, [#allocation6]  }
 0x32b   : > { %1408 = dma.done.wait (%p1332_p10), [#allocation6], 32  }
 0x32c   : > { %1410 = vsyncadd (%p1332_p10), [#allocation6], 4294967264 }
 0x32d PF: > { %s26_s14 = sadd.s32 1, %s1413_s14  }
 0x32e   : > { %p23_p9 = scmp.ge.s32.totalorder %s26_s14, 10  }
 0x330   :  { %25 = sbr.rel (!%p23_p9) target bundleno = 17 (0x11), region = 88 }
 0x337   :  { %966 = vsyncpa [#allocation6], 1 }
 0x338   :  { %968 = vsyncpa [#allocation6 + $0x1], 1 }

</bundles_post_ra>
